<compile_context>
chip_gen: v6e
topology: v6e:2x2x1
jax: 0.10.0
libtpu: 0.0.40
codegen_flags: <defaults>
</compile_context>

<pallas_src>
import math
import functools

import jax
import jax.numpy as jnp
from jax import lax
from jax.experimental import pallas as pl
from jax.experimental.pallas import tpu as pltpu


def _cdiv(a, b):
    return -(-a // b)


def _round_up(a, m):
    return (a + m - 1) // m * m


def _gelu_tanh(x):
    # torch.nn.GELU(approximate='tanh'): tanh routes to the EUP slot.
    c = math.sqrt(2.0 / math.pi)
    return 0.5 * x * (1.0 + jnp.tanh(c * (x + 0.044715 * x * x * x)))


def _residual_kernel(x_ref, w_ref, b_ref, o_ref, *, precision):
    """o = gelu_tanh(W @ x + b) + x for one (rows, ts) channels-major block.

    `rows` is either bn*C (folded 2-D mode, W is block-diagonal kron(I_bn, W))
    or C (per-image 3-D mode with a squeezed leading dim).  Spatial sits on
    the lane axis in both modes.
    """
    x = x_ref[...]                       # (rows, ts), native dtype
    w = w_ref[...]                       # (rows, rows), native dtype
    b = b_ref[...]                       # (rows, 1), float32
    y = jnp.dot(w, x, preferred_element_type=jnp.float32, precision=precision) + b
    y = _gelu_tanh(y) + x.astype(jnp.float32)
    o_ref[...] = y.astype(o_ref.dtype)


def _plan_tiles(N, C, HW, itemsize):
    """Returns (fold, bn, ts).

    fold=True  -> folded 2-D layout (N*C, HW), block (bn*C, ts).
    fold=False -> per-image 3-D layout (N, C, HW), block (1->squeezed, C, ts).

    Budget counts (8,128)-tiled VMEM: sublane pack (8 f32 / 16 bf16 / 32 int8)
    and lane padding, the double-buffered weight, and the in-kernel f32
    temporaries, targeting ~2 MiB x-blocks and < ~12 MiB total (fits the
    16 MiB v5e default scoped limit; plenty of slack on v6e/v7x).
    """
    pack = max(8, 32 // itemsize)          # sublanes per packed (8,128) tile
    lane = 128
    target = 2 * 1024 * 1024               # ~2 MiB / x block ~= 85% HBM roofline
    row_cap = 256                          # bounds kron weight & MXU K per elem

    hw_pad = _round_up(HW, lane)
    c_pad = _round_up(C, pack)

    # A single image's padded block already exceeds the target: tile spatially,
    # one image per step (C is the full 2nd-minor dim -> always tile-legal).
    if c_pad * hw_pad * itemsize > target:
        w_bytes = 2 * c_pad * _round_up(C, lane) * itemsize     # dbl-buffered W
        budget = max(512 * 1024, 12 * 1024 * 1024 - w_bytes)
        per_block = budget // 6            # 2x x, 2x out, ~2x for f32 temps
        ts = max(lane, min(per_block // (c_pad * itemsize), hw_pad) // lane * lane)
        ts = HW if ts >= HW else ts
        return False, 1, ts

    # Whole spatial extent fits one block: fold batch onto the sublane axis.
    ts = HW

    def legal(bn):
        rows = bn * C
        return N % bn == 0 and (rows % pack == 0 or rows == N * C)

    bn_hi = min(N,
                max(1, row_cap // C),
                max(1, target // max(1, C * hw_pad * itemsize)))
    bn = 0
    for cand in range(bn_hi, 0, -1):
        if legal(cand):
            bn = cand
            break
    if bn == 0:
        # No tile-legal fold under the caps: per-image 3-D blocks instead.
        return False, 1, ts

    # v7x has 2 TensorCores: keep >= 2 grid steps when there is more than one
    # image (cheaper than idling a core; extra steps also feed the pipeline).
    if _cdiv(N, bn) < 2 <= N:
        for cand in range(min(bn, N - 1), 0, -1):
            if legal(cand):
                bn = cand
                break
    return True, bn, ts


@jax.jit
def residual_forward(x_nchw, weight, bias):
    """Residual(fn)(x) with fn = GELU_tanh(Conv2d(C, C, kernel_size=1)), NCHW."""
    N, C, H, W = x_nchw.shape
    HW = H * W
    itemsize = jnp.dtype(x_nchw.dtype).itemsize

    fold, bn, ts = _plan_tiles(N, C, HW, itemsize)
    precision = (lax.Precision.HIGHEST if x_nchw.dtype == jnp.float32
                 else lax.Precision.DEFAULT)
    kernel = functools.partial(_residual_kernel, precision=precision)

    w = weight.astype(x_nchw.dtype)        # torch (out, in) layout, used as W @ X
    bias_f32 = bias.astype(jnp.float32)
    cparams = pltpu.CompilerParams(dimension_semantics=("parallel", "parallel"))

    if fold:
        rows = bn * C
        # Free reshape (row-major NCHW): rows = (image, channel), cols = spatial.
        x2 = x_nchw.reshape(N * C, HW)
        # Block-diagonal weight replicates W once per folded image, so a single
        # MXU matmul per grid step handles bn images with dense sublanes.
        w_big = jnp.kron(jnp.eye(bn, dtype=w.dtype), w) if bn > 1 else w
        b_big = jnp.tile(bias_f32, bn).reshape(rows, 1)
        grid = (_cdiv(N, bn), _cdiv(HW, ts))

        out2 = pl.pallas_call(
            kernel,
            out_shape=jax.ShapeDtypeStruct((N * C, HW), x_nchw.dtype),
            grid_spec=pltpu.PrefetchScalarGridSpec(
                num_scalar_prefetch=0,
                grid=grid,
                in_specs=[
                    pl.BlockSpec((rows, ts), lambda nb, s: (nb, s)),   # x block
                    pl.BlockSpec((rows, rows), lambda nb, s: (0, 0)),  # kron(I, W)
                    pl.BlockSpec((rows, 1), lambda nb, s: (0, 0)),     # bias
                ],
                out_specs=pl.BlockSpec((rows, ts), lambda nb, s: (nb, s)),
            ),
            compiler_params=cparams,
        )(x2, w_big, b_big)
        return out2.reshape(N, C, H, W)

    # Per-image 3-D blocks (single image already >= block target, or folding is
    # not tile-legal).  Leading dim is squeezed -> kernel still sees (C, ts).
    x3 = x_nchw.reshape(N, C, HW)
    b2 = bias_f32.reshape(C, 1)
    grid = (N, _cdiv(HW, ts))

    out3 = pl.pallas_call(
        kernel,
        out_shape=jax.ShapeDtypeStruct((N, C, HW), x_nchw.dtype),
        grid_spec=pltpu.PrefetchScalarGridSpec(
            num_scalar_prefetch=0,
            grid=grid,
            in_specs=[
                pl.BlockSpec((None, C, ts), lambda n, s: (n, 0, s)),   # x block
                pl.BlockSpec((C, C), lambda n, s: (0, 0)),             # weight
                pl.BlockSpec((C, 1), lambda n, s: (0, 0)),             # bias
            ],
            out_specs=pl.BlockSpec((None, C, ts), lambda n, s: (n, 0, s)),
        ),
        compiler_params=cparams,
    )(x3, w, b2)
    return out3.reshape(N, C, H, W)


def _reference(x_nchw, weight, bias):
    # Pure-JAX reference: exact-f32 elementwise 1x1 conv + tanh-GELU + residual.
    xf = x_nchw.astype(jnp.float32)
    wf = weight.astype(jnp.float32)
    y = (wf[None, :, :, None, None] * xf[:, None, :, :, :]).sum(axis=2)
    y = y + bias.astype(jnp.float32)[None, :, None, None]
    y = _gelu_tanh(y) + xf
    return y.astype(x_nchw.dtype)


if __name__ == "__main__":
    key = jax.random.PRNGKey(0)
    kx, kw, kb = jax.random.split(key, 3)

    # Config 1: tiny channel count (exercises the folded block-diagonal path).
    N, C, H, W = 2, 4, 16, 16
    x = jax.random.normal(kx, (N, C, H, W), dtype=jnp.float32)
    bound = 1.0 / math.sqrt(C)
    weight = jax.random.uniform(kw, (C, C), jnp.float32, -bound, bound)  # (out, in)
    bias = jax.random.uniform(kb, (C,), jnp.float32, -bound, bound)

    out = jax.block_until_ready(residual_forward(x, weight, bias))
    ref = _reference(x, weight, bias)
    assert out.shape == (N, C, H, W)
    assert jnp.max(jnp.abs(out - ref)) < 1e-4

    # Config 2: larger C (no kron; bn=1 so the grid keeps 2 parallel steps).
    k2x, k2w, k2b = jax.random.split(jax.random.PRNGKey(1), 3)
    N2, C2, H2, W2 = 2, 32, 16, 16
    x2 = jax.random.normal(k2x, (N2, C2, H2, W2), dtype=jnp.float32)
    bound2 = 1.0 / math.sqrt(C2)
    w2 = jax.random.uniform(k2w, (C2, C2), jnp.float32, -bound2, bound2)
    bias2 = jax.random.uniform(k2b, (C2,), jnp.float32, -bound2, bound2)
    out2 = jax.block_until_ready(residual_forward(x2, w2, bias2))
    ref2 = _reference(x2, w2, bias2)
    assert out2.shape == (N2, C2, H2, W2)
    assert jnp.max(jnp.abs(out2 - ref2)) < 1e-4

    print("KERNEL_OK")
</pallas_src>

<mosaic_0001>
module attributes {stable_mosaic.version = 11 : i64} {
  func.func @_residual_kernel(%arg0: i32, %arg1: i32, %arg2: memref<8x256xf32, #tpu.memory_space<vmem>>, %arg3: memref<8x8xf32, #tpu.memory_space<vmem>>, %arg4: memref<8x1xf32, #tpu.memory_space<vmem>>, %arg5: memref<8x256xf32, #tpu.memory_space<vmem>>) attributes {dimension_semantics = [#tpu.dimension_semantics<parallel>, #tpu.dimension_semantics<parallel>], iteration_bounds = array<i64: 1, 1>, scalar_prefetch = 0 : i64, scratch_operands = 0 : i64, tpu.core_type = #tpu.core_type<tc>, window_params = [{transform_indices = @transform_0, window_bounds = array<i64: 8, 256>}, {pipeline_mode = #tpu.pipeline_mode<synchronous>, transform_indices = @transform_1, window_bounds = array<i64: 8, 8>}, {pipeline_mode = #tpu.pipeline_mode<synchronous>, transform_indices = @transform_2, window_bounds = array<i64: 8, 1>}, {transform_indices = @transform_3, window_bounds = array<i64: 8, 256>}]} {
    %c0 = arith.constant 0 : index
    %c0_0 = arith.constant 0 : index
    %0 = vector.load %arg2[%c0, %c0_0] : memref<8x256xf32, #tpu.memory_space<vmem>>, vector<8x256xf32>
    %c0_1 = arith.constant 0 : index
    %c0_2 = arith.constant 0 : index
    %1 = vector.load %arg3[%c0_1, %c0_2] : memref<8x8xf32, #tpu.memory_space<vmem>>, vector<8x8xf32>
    %c0_3 = arith.constant 0 : index
    %c0_4 = arith.constant 0 : index
    %2 = vector.load %arg4[%c0_3, %c0_4] : memref<8x1xf32, #tpu.memory_space<vmem>>, vector<8x1xf32>
    %cst = arith.constant dense<0.000000e+00> : vector<8x256xf32>
    %3 = tpu.matmul %1, %0, %cst {dimension_numbers = #tpu.dot_dimension_numbers<[1], [0], [0], [1], [0, 0, 1, 1], [], []>, precision = #tpu.contract_precision<fp32>} : vector<8x8xf32>, vector<8x256xf32>, vector<8x256xf32> -> vector<8x256xf32>
    %4 = vector.broadcast %2 : vector<8x1xf32> to vector<8x256xf32>
    %5 = arith.addf %3, %4 : vector<8x256xf32>
    %cst_5 = arith.constant 5.000000e-01 : f32
    %6 = vector.broadcast %cst_5 : f32 to vector<8x256xf32>
    %7 = arith.mulf %6, %5 : vector<8x256xf32>
    %cst_6 = arith.constant 4.471500e-02 : f32
    %8 = vector.broadcast %cst_6 : f32 to vector<8x256xf32>
    %9 = arith.mulf %8, %5 : vector<8x256xf32>
    %10 = arith.mulf %9, %5 : vector<8x256xf32>
    %11 = arith.mulf %10, %5 : vector<8x256xf32>
    %12 = arith.addf %5, %11 : vector<8x256xf32>
    %cst_7 = arith.constant 0.797884583 : f32
    %13 = vector.broadcast %cst_7 : f32 to vector<8x256xf32>
    %14 = arith.mulf %13, %12 : vector<8x256xf32>
    %15 = math.tanh %14 : vector<8x256xf32>
    %cst_8 = arith.constant 1.000000e+00 : f32
    %16 = vector.broadcast %cst_8 : f32 to vector<8x256xf32>
    %17 = arith.addf %16, %15 : vector<8x256xf32>
    %18 = arith.mulf %7, %17 : vector<8x256xf32>
    %19 = arith.addf %18, %0 : vector<8x256xf32>
    %c0_9 = arith.constant 0 : index
    %c0_10 = arith.constant 0 : index
    %20 = vector.load %arg5[%c0_9, %c0_10] : memref<8x256xf32, #tpu.memory_space<vmem>>, vector<8x256xf32>
    tpu.vector_store %arg5[%c0_9, %c0_10], %19 {strides = array<i32>} : memref<8x256xf32, #tpu.memory_space<vmem>>, vector<8x256xf32>,
    return
  }
  func.func @transform_0(%arg0: i32, %arg1: i32) -> (i32, i32) {
    %c0_i32 = arith.constant 0 : i32
    return %arg0, %arg1 : i32, i32
  }
  func.func @transform_1(%arg0: i32, %arg1: i32) -> (i32, i32) {
    %c0_i32 = arith.constant 0 : i32
    %c0_i32_0 = arith.constant 0 : i32
    %c0_i32_1 = arith.constant 0 : i32
    return %c0_i32, %c0_i32_0 : i32, i32
  }
  func.func @transform_2(%arg0: i32, %arg1: i32) -> (i32, i32) {
    %c0_i32 = arith.constant 0 : i32
    %c0_i32_0 = arith.constant 0 : i32
    %c0_i32_1 = arith.constant 0 : i32
    return %c0_i32, %c0_i32_0 : i32, i32
  }
  func.func @transform_3(%arg0: i32, %arg1: i32) -> (i32, i32) {
    %c0_i32 = arith.constant 0 : i32
    return %arg0, %arg1 : i32, i32
  }
}

</mosaic_0001>

<bundles_post_ra>
// kernel: tile.8
= control target key start
LH: loop header
LB: loop body
LE: loop exit
PB: predicated region body
PF: predicated region fallthrough
CT: control target
= control target key end

     0   :  { %s22_s0 = inlined_call_operand.vmem [shape: f32[4], index: 0, kind: input, shape index: {}]   ;;  %s23_s1 = inlined_call_operand.vmem [shape: f32[2,4], index: 1, kind: output, shape index: {}]  }
   0x1   :  { %v4_v0 = vld [vmem:[%s22_s0] ss:$0 sm:$0xff] }
   0x2   :  { %5 = vst [vmem:[%s23_s1] sm:$0x3] %v4_v0 }

// kernel: tile.0
= control target key start
LH: loop header
LB: loop body
LE: loop exit
PB: predicated region body
PF: predicated region fallthrough
CT: control target
= control target key end

     0   :  { %s35_s8 = smov 125   ;;  %vm8_vm0 = vcmask 7168   ;;  %s36_s11 = smov 126   ;;  %s62_s0 = inlined_call_operand.vmem [shape: f32[2,4], index: 0, kind: input, shape index: {}]   ;;  %s63_s1 = inlined_call_operand.vmem [shape: f32[8,1], index: 1, kind: output, shape index: {}]  }
   0x1   :  { %v5_v0 = vld [vmem:[%s62_s0] sm:$0x3]  ;;  %s34_s0 = smov 127  }
   0x2   :  { %6 = vst [vmem:[#allocation0] sm:$0x3] %v5_v0 }
   0x9   :  { %v10_v1 = vld [vmem:[#allocation0] sm:$0x3]  }
   0xa   :  { %v22_v2 = vld [vmem:[#allocation0] sm:$0x3]   ;;  %11 = vrot.lane.b32.xlu0 %v10_v1, %s34_s0 }
   0xb   :  { %23 = vrot.lane.b32.xlu1 %v22_v2, %s35_s8  ;;  %v7_v3 = vld [vmem:[#allocation0] sm:$0x3]  }
   0xc   :  { %v16_v4 = vld [vmem:[#allocation0] sm:$0x3]   ;;  %9 = vst.msk [vmem:[%s63_s1] ss:$4 sm:$0x3] %vm8_vm0, %v7_v3  }
   0xe   :  { %17 = vrot.lane.b32.xlu0 %v16_v4, %s36_s11 }
  0x7c   :  { %v12_v5 = vpop.permute.xlu0 %11  }
  0x7d   :  { %v24_v6 = vpop.permute.xlu1 %23   ;;  %28 = vst.msk [vmem:[%s63_s1 + $0x1] ss:$4 sm:$0x3] %vm8_vm0, %v12_v5  }
  0x7e   :  { %30 = vst.msk [vmem:[%s63_s1 + $0x3] ss:$4 sm:$0x3] %vm8_vm0, %v24_v6  }
  0x80   :  { %v18_v7 = vpop.permute.xlu0 %17  }
  0x81   :  { %29 = vst.msk [vmem:[%s63_s1 + $0x2] ss:$4 sm:$0x3] %vm8_vm0, %v18_v7  }

// kernel: residual_forward.1
= control target key start
LH: loop header
LB: loop body
LE: loop exit
PB: predicated region body
PF: predicated region fallthrough
CT: control target
= control target key end

     0   :  { %vm23_vm0 = vcmask 64512   ;;  %v525_v2 = vmov 0.0   ;;  %v526_v7 = vmov 0   ;;  %s575_s0 = inlined_call_operand.vmem [shape: f32[8,256], index: 0, kind: input, shape index: {}]   ;;  %s576_s1 = inlined_call_operand.vmem [shape: f32[8,8], index: 1, kind: input, shape index: {}]   ;;  %s577_s2 = inlined_call_operand.vmem [shape: f32[8,1], index: 2, kind: input, shape index: {}]   ;;  %s578_s3 = inlined_call_operand.vmem [shape: f32[8,256], index: 3, kind: output, shape index: {}]  }
   0x1   :  { %v550_v0 = vld [vmem:[%s575_s0 + $0x8] sm:$0xff]  ;;  %v555_v1 = vld [vmem:[%s575_s0] sm:$0xff]  ;;  %93 = vmatprep.mubr.f32.mxu0 %v525_v2  ;;  %179 = vmatprep.mubr.f32.mxu1 %v525_v2 }
   0x2   :  { %v16_v3 = vld [vmem:[%s576_s1] sm:$0xff]  ;;  %v57_v4 = vand.u32 4294901760, %v550_v0  ;;  %v59_v5 = vand.u32 4294901760, %v555_v1  ;;  %520 = vset.pattern.permute.xlu0 %v526_v7 }
   0x3   :  { %v25_v6 = vsel %vm23_vm0, %v16_v3, 0  ;;  %v17_v8 = vld [vmem:[%s577_s2] sm:$0xff] }
   0x4   :  { %v94_v9 = vand.u32 4294901760, %v25_v6  ;;  %20 = vperm.xlu0 %520, %v17_v8   ;;  %58 = vmatprep.subr.mxu0 %v57_v4  ;;  %v136_v10 = vsub.f32 %v550_v0, %v57_v4  ;;  %v142_v11 = vsub.f32 %v555_v1, %v59_v5 }
   0x5   :  { %60 = vmatpush1.msra.mxu0 %v59_v5 }
   0x6   :  { %v95_v12 = vsub.f32 %v25_v6, %v94_v9  ;;  %v137_v13 = vand.u32 4294901760, %v136_v10  ;;  %219 = vmatprep.subr.mxu0 %v136_v10  ;;  %v143_v14 = vand.u32 4294901760, %v142_v11 }
   0x8   :  { %v96_v15 = vand.u32 4294901760, %v95_v12  ;;  %v138_v16 = vsub.f32 %v136_v10, %v137_v13  ;;  %v144_v17 = vsub.f32 %v142_v11, %v143_v14 }
   0xa   :  { %v97_v18 = vsub.f32 %v95_v12, %v96_v15  ;;  %v139_v19 = vand.u32 4294901760, %v138_v16  ;;  %v145_v20 = vand.u32 4294901760, %v144_v17 }
   0xc   :  { %v98_v21 = vand.u32 4294901760, %v97_v18  ;;  %140 = vmatprep.subr.mxu1 %v139_v19 }
   0xd   :  { %146 = vmatpush1.msra.mxu1 %v145_v20 }
   0xe   :  { %99 = vmatmul.mubr.f32.vlgmr.msra.gmra.mxu0 %v98_v21  ;;  %181 = vmatmul.mubr.f32.vlgmr.msra.gmra.mxu1 %v94_v9 }
   0xf   :  { %222 = vmatpush1.msra.mxu0 %v142_v11  ;;  %295 = vmatprep.subr.mxu1 %v57_v4 }
  0x10   :  { %255 = vmatprep.mubr.f32.mxu0 %v525_v2  ;;  %297 = vmatpush1.msra.mxu1 %v59_v5 }
  0x11   :  { %373 = vmatprep.subr.mxu0 %v137_v13  ;;  %330 = vmatprep.mubr.f32.mxu1 %v525_v2 }
  0x12   :  { %258 = vmatmul.mubr.f32.vlgmr.msra.gmra.mxu0 %v95_v12  ;;  %334 = vmatmul.mubr.f32.vlgmr.msra.gmra.mxu1 %v96_v15 }
  0x13   :  { %377 = vmatpush1.msra.mxu0 %v143_v14  ;;  %449 = vmatprep.subr.mxu1 %v57_v4 }
  0x14   :  { %410 = vmatprep.mubr.f32.mxu0 %v525_v2  ;;  %451 = vmatpush1.msra.mxu1 %v59_v5 }
  0x15   :  { %484 = vmatprep.mubr.f32.mxu1 %v525_v2 }
  0x16   :  { %412 = vmatmul.mubr.f32.vlgmr.msra.gmra.mxu0 %v94_v9  ;;  %486 = vmatmul.mubr.f32.vlgmr.msra.gmra.mxu1 %v94_v9 }
  0x7f   :  { %v21_v22 = vpop.permute.xlu0 %20 }
  0xce   :  { %v100_v23 = vpop.f32.mrf.mxu0  ;;  %v182_v25 = vpop.f32.mrf.mxu1 }
  0xcf   :  { %v101_v24 = vadd.f32 %v100_v23, %v21_v22 }
  0xd0   :  { %v102_v26 = vpop.f32.mrf.mxu0  ;;  %v184_v29 = vpop.f32.mrf.mxu1 }
  0xd1   :  { %v183_v27 = vadd.f32 %v182_v25, %v101_v24  ;;  %v103_v28 = vadd.f32 %v102_v26, %v21_v22 }
  0xd2   :  { %v259_v30 = vpop.f32.mrf.mxu0  ;;  %v335_v33 = vpop.f32.mrf.mxu1 }
  0xd3   :  { %v185_v31 = vadd.f32 %v184_v29, %v103_v28  ;;  %v260_v32 = vadd.f32 %v259_v30, %v183_v27 }
  0xd4   :  { %v261_v34 = vpop.f32.mrf.mxu0  ;;  %v337_v37 = vpop.f32.mrf.mxu1 }
  0xd5   :  { %v336_v35 = vadd.f32 %v335_v33, %v260_v32  ;;  %v262_v36 = vadd.f32 %v261_v34, %v185_v31 }
  0xd6   :  { %v413_v38 = vpop.f32.mrf.mxu0  ;;  %v487_v41 = vpop.f32.mrf.mxu1 }
  0xd7   :  { %v338_v39 = vadd.f32 %v337_v37, %v262_v36  ;;  %v414_v40 = vadd.f32 %v413_v38, %v336_v35 }
  0xd8   :  { %v415_v42 = vpop.f32.mrf.mxu0  ;;  %v489_v45 = vpop.f32.mrf.mxu1 }
  0xd9   :  { %v488_v43 = vadd.f32 %v487_v41, %v414_v40  ;;  %v416_v44 = vadd.f32 %v415_v42, %v338_v39 }
  0xdb   :  { %v494_v46 = vmul.f32 0.044715, %v488_v43  ;;  %v490_v47 = vadd.f32 %v489_v45, %v416_v44  ;;  %v492_v58 = vmul.f32 0.5, %v488_v43 }
  0xdd   :  { %v496_v48 = vmul.f32 %v494_v46, %v488_v43  ;;  %v495_v49 = vmul.f32 0.044715, %v490_v47  ;;  %v493_v62 = vmul.f32 0.5, %v490_v47 }
  0xdf   :  { %v498_v50 = vmul.f32 %v496_v48, %v488_v43  ;;  %v497_v51 = vmul.f32 %v495_v49, %v490_v47 }
  0xe1   :  { %v500_v52 = vadd.f32 %v498_v50, %v488_v43  ;;  %v499_v53 = vmul.f32 %v497_v51, %v490_v47 }
  0xe3   :  { %v502_v54 = vmul.f32 0.7978846, %v500_v52  ;;  %v501_v55 = vadd.f32 %v499_v53, %v490_v47 }
  0xe5   :  { %521 = vtanh.f32 %v502_v54  ;;  %v503_v56 = vmul.f32 0.7978846, %v501_v55 }
  0xe7   :  { %523 = vtanh.f32 %v503_v56 }
  0xf2   :  { %v522_v57 = vpop.eup %521 }
  0xf3   :  { %v506_v59 = vadd.f32 1.0, %v522_v57 }
  0xf4   :  { %v524_v60 = vpop.eup %523 }
  0xf5   :  { %v508_v61 = vmul.f32 %v506_v59, %v492_v58  ;;  %v507_v63 = vadd.f32 1.0, %v524_v60 }
  0xf7   :  { %v510_v2 = vadd.f32 %v508_v61, %v555_v1  ;;  %v509_v3 = vmul.f32 %v507_v63, %v493_v62 }
  0xf9   :  { %512 = vst [vmem:[%s578_s3] sm:$0xff] %v510_v2  ;;  %v511_v4 = vadd.f32 %v509_v3, %v550_v0 }
  0xfb   :  { %513 = vst [vmem:[%s578_s3 + $0x8] sm:$0xff] %v511_v4 }

</bundles_post_ra>
